<compile_context>
chip_gen: v7x
topology: tpu7x:2x2x1
jax: 0.10.0
libtpu: 0.0.40
codegen_flags: <defaults>
</compile_context>

<pallas_src>
import functools

import jax
import jax.numpy as jnp
from jax.experimental import pallas as pl
from jax.experimental.pallas import tpu as pltpu

MAX_SEQ_LEN = 64
NUM_CLASSES = 3
OUT_PAD = 128  # lane-dense padded output-feature width


def onehot_linear_kernel(x_ref, w_ref, b_ref, out_ref):
    # x_ref:   (B, S)        int32 tokens, pad value -1 -> all-zero one-hot row
    # w_ref:   (C*S, OUT_PAD) f32, row c*S + s holds W[:, s*C + c] (zero-padded lanes)
    # b_ref:   (1, OUT_PAD)   f32 bias (zero-padded lanes)
    # out_ref: (B, OUT_PAD)   f32
    x = x_ref[...]
    # Fused one-hot in c-major layout: mask[b, c*S + s] = (x[b, s] == c).
    mask = jnp.concatenate(
        [(x == c).astype(jnp.float32) for c in range(NUM_CLASSES)], axis=1
    )  # (B, C*S)
    out_ref[...] = (
        jnp.dot(mask, w_ref[...], preferred_element_type=jnp.float32)
        + b_ref[...]
    )


def prepare_params(weight, bias, *, max_seq_len=MAX_SEQ_LEN,
                   num_classes=NUM_CLASSES):
    """One-time rearrangement of the torch nn.Linear parameters (hoisted out
    of the forward).

    weight: (C_out, S*C) with column index s*C + c (torch flatten order)
         -> (C*S, OUT_PAD) with row index c*S + s, lane-padded to 128.
    bias:   (C_out,) -> (1, OUT_PAD), lane-padded.
    """
    c_out = num_classes
    w_k = jnp.transpose(
        weight.reshape(c_out, max_seq_len, num_classes), (2, 1, 0)
    ).reshape(num_classes * max_seq_len, c_out).astype(jnp.float32)
    w_k = jnp.pad(w_k, ((0, 0), (0, OUT_PAD - c_out)))
    b_k = jnp.pad(bias.astype(jnp.float32),
                  (0, OUT_PAD - c_out)).reshape(1, OUT_PAD)
    return w_k, b_k


@functools.partial(jax.jit, static_argnames=("max_seq_len", "num_classes"))
def simple_linear_forward(x, w_k, b_k, *, max_seq_len=MAX_SEQ_LEN,
                          num_classes=NUM_CLASSES):
    """x: (B, L) int tokens in [0, num_classes).
    w_k, b_k: prepared params from prepare_params()."""
    B, L = x.shape
    # pad / truncate tokens to max_seq_len; pad token -1 one-hots to all zeros,
    # matching torch's explicit zero padding of x_onehot.
    if L < max_seq_len:
        x_pad = jnp.concatenate(
            [x, jnp.full((B, max_seq_len - L), -1, dtype=x.dtype)], axis=1)
    else:
        x_pad = x[:, :max_seq_len]
    x_pad = x_pad.astype(jnp.int32)

    K = num_classes * max_seq_len  # 192

    out = pl.pallas_call(
        onehot_linear_kernel,
        out_shape=jax.ShapeDtypeStruct((B, OUT_PAD), jnp.float32),
        grid=(1,),
        in_specs=[
            pl.BlockSpec((B, max_seq_len), lambda i: (0, 0)),
            pl.BlockSpec((K, OUT_PAD), lambda i: (0, 0)),
            pl.BlockSpec((1, OUT_PAD), lambda i: (0, 0)),
        ],
        out_specs=pl.BlockSpec((B, OUT_PAD), lambda i: (0, 0)),
        compiler_params=pltpu.CompilerParams(
            dimension_semantics=("arbitrary",)),
        # TODO(synk): if B ever scales, tile the grid over batch blocks
        # (multiple of 8) with dimension_semantics=("parallel",) to use both
        # TensorCores on v7x.
    )(x_pad, w_k, b_k)

    out = out[:, :num_classes]            # drop the 125 zero-padded lanes
    # out.unsqueeze(1).expand(-1, L, -1)
    return jnp.broadcast_to(out[:, None, :], (B, L, num_classes))


if __name__ == "__main__":
    key = jax.random.PRNGKey(0)
    k_x, k_w, k_b = jax.random.split(key, 3)

    B, L = 2, 8  # small seq, zero-padded up to MAX_SEQ_LEN inside
    x = jax.random.randint(k_x, (B, L), 0, NUM_CLASSES, dtype=jnp.int32)

    # Deterministic param init (torch Linear default: U(-1/sqrt(fan_in), ...)).
    fan_in = MAX_SEQ_LEN * NUM_CLASSES
    bound = 1.0 / jnp.sqrt(fan_in)
    weight = jax.random.uniform(k_w, (NUM_CLASSES, fan_in),
                                minval=-bound, maxval=bound,
                                dtype=jnp.float32)
    bias = jax.random.uniform(k_b, (NUM_CLASSES,),
                              minval=-bound, maxval=bound, dtype=jnp.float32)

    # Parameter prep done once, outside the forward (hoisted).
    w_k, b_k = prepare_params(weight, bias)

    out = simple_linear_forward(x, w_k, b_k)
    out = jax.block_until_ready(out)

    # Pure-JAX reference of the torch forward pass.
    onehot = jax.nn.one_hot(x, NUM_CLASSES, dtype=jnp.float32)      # (B, L, C)
    pad = jnp.zeros((B, MAX_SEQ_LEN - L, NUM_CLASSES), jnp.float32)
    x_flat = jnp.concatenate([onehot, pad], axis=1).reshape(B, -1)  # (B, S*C)
    ref = x_flat @ weight.T + bias                                  # (B, C)
    ref = jnp.broadcast_to(ref[:, None, :], (B, L, NUM_CLASSES))

    assert out.shape == (B, L, NUM_CLASSES)
    assert jnp.allclose(out, ref, atol=1e-5, rtol=1e-5)
    print("KERNEL_OK")
</pallas_src>

<mosaic_0001>
module attributes {stable_mosaic.version = 11 : i64} {
  func.func @onehot_linear_kernel(%arg0: i32, %arg1: memref<2x64xi32, #tpu.memory_space<vmem>>, %arg2: memref<192x128xf32, #tpu.memory_space<vmem>>, %arg3: memref<1x128xf32, #tpu.memory_space<vmem>>, %arg4: memref<2x128xf32, #tpu.memory_space<vmem>>) attributes {dimension_semantics = [#tpu.dimension_semantics<arbitrary>], iteration_bounds = array<i64: 1>, scalar_prefetch = 0 : i64, scratch_operands = 0 : i64, tpu.core_type = #tpu.core_type<tc>, window_params = [{pipeline_mode = #tpu.pipeline_mode<synchronous>, transform_indices = @transform_0, window_bounds = array<i64: 2, 64>}, {pipeline_mode = #tpu.pipeline_mode<synchronous>, transform_indices = @transform_1, window_bounds = array<i64: 192, 128>}, {pipeline_mode = #tpu.pipeline_mode<synchronous>, transform_indices = @transform_2, window_bounds = array<i64: 1, 128>}, {pipeline_mode = #tpu.pipeline_mode<synchronous>, transform_indices = @transform_3, window_bounds = array<i64: 2, 128>}]} {
    %c0 = arith.constant 0 : index
    %c0_0 = arith.constant 0 : index
    %0 = vector.load %arg1[%c0, %c0_0] : memref<2x64xi32, #tpu.memory_space<vmem>>, vector<2x64xi32>
    %c0_i32 = arith.constant 0 : i32
    %1 = vector.broadcast %c0_i32 : i32 to vector<2x64xi32>
    %2 = arith.cmpi eq, %0, %1 : vector<2x64xi32>
    %3 = arith.extui %2 : vector<2x64xi1> to vector<2x64xi32>
    %4 = arith.sitofp %3 : vector<2x64xi32> to vector<2x64xf32>
    %c1_i32 = arith.constant 1 : i32
    %5 = vector.broadcast %c1_i32 : i32 to vector<2x64xi32>
    %6 = arith.cmpi eq, %0, %5 : vector<2x64xi32>
    %7 = arith.extui %6 : vector<2x64xi1> to vector<2x64xi32>
    %8 = arith.sitofp %7 : vector<2x64xi32> to vector<2x64xf32>
    %c2_i32 = arith.constant 2 : i32
    %9 = vector.broadcast %c2_i32 : i32 to vector<2x64xi32>
    %10 = arith.cmpi eq, %0, %9 : vector<2x64xi32>
    %11 = arith.extui %10 : vector<2x64xi1> to vector<2x64xi32>
    %12 = arith.sitofp %11 : vector<2x64xi32> to vector<2x64xf32>
    %13 = tpu.concatenate %4, %8, %12 in 1 : vector<2x64xf32>, vector<2x64xf32>, vector<2x64xf32> -> vector<2x192xf32>
    %c0_1 = arith.constant 0 : index
    %c0_2 = arith.constant 0 : index
    %14 = vector.load %arg2[%c0_1, %c0_2] : memref<192x128xf32, #tpu.memory_space<vmem>>, vector<192x128xf32>
    %cst = arith.constant dense<0.000000e+00> : vector<2x128xf32>
    %15 = tpu.matmul %13, %14, %cst {dimension_numbers = #tpu.dot_dimension_numbers<[1], [0], [0], [1], [0, 0, 1, 1], [], []>} : vector<2x192xf32>, vector<192x128xf32>, vector<2x128xf32> -> vector<2x128xf32>
    %c0_3 = arith.constant 0 : index
    %c0_4 = arith.constant 0 : index
    %16 = vector.load %arg3[%c0_3, %c0_4] : memref<1x128xf32, #tpu.memory_space<vmem>>, vector<1x128xf32>
    %17 = vector.broadcast %16 : vector<1x128xf32> to vector<2x128xf32>
    %18 = arith.addf %15, %17 : vector<2x128xf32>
    %c0_5 = arith.constant 0 : index
    %c0_6 = arith.constant 0 : index
    %19 = vector.load %arg4[%c0_5, %c0_6] : memref<2x128xf32, #tpu.memory_space<vmem>>, vector<2x128xf32>
    tpu.vector_store %arg4[%c0_5, %c0_6], %18 {strides = array<i32>} : memref<2x128xf32, #tpu.memory_space<vmem>>, vector<2x128xf32>,
    return
  }
  func.func @transform_0(%arg0: i32) -> (i32, i32) {
    %c0_i32 = arith.constant 0 : i32
    %c0_i32_0 = arith.constant 0 : i32
    %c0_i32_1 = arith.constant 0 : i32
    return %c0_i32, %c0_i32_0 : i32, i32
  }
  func.func @transform_1(%arg0: i32) -> (i32, i32) {
    %c0_i32 = arith.constant 0 : i32
    %c0_i32_0 = arith.constant 0 : i32
    %c0_i32_1 = arith.constant 0 : i32
    return %c0_i32, %c0_i32_0 : i32, i32
  }
  func.func @transform_2(%arg0: i32) -> (i32, i32) {
    %c0_i32 = arith.constant 0 : i32
    %c0_i32_0 = arith.constant 0 : i32
    %c0_i32_1 = arith.constant 0 : i32
    return %c0_i32, %c0_i32_0 : i32, i32
  }
  func.func @transform_3(%arg0: i32) -> (i32, i32) {
    %c0_i32 = arith.constant 0 : i32
    %c0_i32_0 = arith.constant 0 : i32
    %c0_i32_1 = arith.constant 0 : i32
    return %c0_i32, %c0_i32_0 : i32, i32
  }
}

</mosaic_0001>

<bundles_post_ra>
// kernel: simple_linear_forward.1
= control target key start
LH: loop header
LB: loop body
LE: loop exit
PB: predicated region body
PF: predicated region fallthrough
CT: control target
= control target key end

     0   :  { %8 = vsyncpa [#allocation3], 0  ;;  %s225_s12 = smov [#allocation2]   ;;  %s286_s0 = inlined_call_operand.vmem [shape: s32[2,64], index: 0, kind: input, shape index: {}]   ;;  %s287_s1 = inlined_call_operand.hbm [shape: f32[192,128], index: 1, kind: input, shape index: {}]   ;;  %s288_s2 = inlined_call_operand.vmem [shape: f32[1,128], index: 2, kind: input, shape index: {}]   ;;  %s289_s3 = inlined_call_operand.vmem [shape: f32[2,128], index: 3, kind: output, shape index: {}]  }
   0x1   :  { %s16_s13 = sshll.u32 %s225_s12, 4  ;;  %s201_s16 = scalar_lea.hbm %s287_s1, 3072  ;;  %s17_s13 = int_to_ptr.vmem [resolvable:$true] %s16_s13 }
   0x2   :  { %p202_p0 = scmp.ne.s32.totalorder %s287_s1, %s201_s16  ;;  %p205_p1 = scmp.lt.u32.totalorder %s201_s16, %s287_s1 }
   0x4   :  { %p207_p2 = pnand %p205_p1, %p202_p0 }
   0x6   :  { %210 = shalt.err (!%p207_p2)
}
   0x7   :  { %s211_s21 = scalar_lea.vmem %s17_s13, 3072  ;;  %p216_p4 = scmp.lt.s32.totalorder %s17_s13, %s17_s13 }
   0x8   :  { %p212_p3 = scmp.ne.s32.totalorder %s17_s13, %s211_s21  ;;  %p217_p5 = scmp.lt.s32.totalorder %s211_s21, %s211_s21 }
   0xa   :  { %p218_p6 = por %p217_p5, %p216_p4 }
   0xc   :  { %p219_p7 = pnand %p218_p6, %p212_p3 }
   0xe   :  { %222 = shalt.err (!%p219_p7)
}
   0xf   :  { %s226_s22 = smov 128   ;;  %s227_s23 = smov 8  }
  0x10   :  { %22 = dma.hbm_to_vmem [thread:$0]  %s287_s1, 3072, %s17_s13, [#allocation3], %s226_s22, %s226_s22, %s227_s23  }
  0x11   :  { %223 = dma.done.wait [#allocation3], 3072  }
  0x12   :  { %224 = vsyncadd [#allocation3], 4294964224  ;;  %v228_v0 = vmov 0.0|0.0   ;;  %v28_v1 = vld [vmem:[%s286_s0] sm:$0x3]  ;;  %v45_v3 = vld [vmem:[#allocation2 + $0x8] sm:$0xff] }
  0x13   :  { %159 = vmatprep.subr.bf16.mxu0 %v228_v0  ;;  %v44_v2 = vld [vmem:[#allocation2] sm:$0xff]  ;;  %vm42_vm0 = vcmask 523264   ;;  %vm32_vm1 = vcmp.eq.s32.totalorder %v28_v1, 1  ;;  %v46_v5 = vld [vmem:[#allocation2 + $0x10] sm:$0xff]  ;;  %v47_v6 = vld [vmem:[#allocation2 + $0x18] sm:$0xff]  ;;  %vm35_vm2 = vcmp.eq.s32.totalorder %v28_v1, 2 }
  0x14   :  { %v160_v4 = vpack.c.bf16 %v45_v3, %v44_v2  ;;  %vm29_vm3 = vcmp.eq.s32.totalorder %v28_v1, 0  ;;  %v229_v7 = vmov 0.0   ;;  %s230_s1 = smov 64   ;;  %v163_v11 = vpack.c.bf16 %v47_v6, %v46_v5  ;;  %v48_v12 = vld [vmem:[#allocation2 + $0x20] sm:$0xff]  ;;  %v49_v13 = vld [vmem:[#allocation2 + $0x28] sm:$0xff]  ;;  %v50_v15 = vld [vmem:[#allocation2 + $0x30] sm:$0xff] }
  0x15   :  { %v155_v8 = vsel %vm32_vm1, 1.0, %v229_v7  ;;  %v156_v9 = vsel %vm35_vm2, 1.0, %v229_v7  ;;  %v154_v10 = vsel %vm29_vm3, 1.0, %v229_v7  ;;  %v166_v14 = vpack.c.bf16 %v49_v13, %v48_v12  ;;  %v51_v16 = vld [vmem:[#allocation2 + $0x38] sm:$0xff]  ;;  %v52_v18 = vld [vmem:[#allocation2 + $0x40] sm:$0xff]  ;;  %v53_v19 = vld [vmem:[#allocation2 + $0x48] sm:$0xff] }
  0x16   :  { %39 = vrot.lane.b32.xlu0 %v155_v8, %s230_s1  ;;  %161 = vmatpush1.bf16.msra.mxu0 %v160_v4  ;;  %v169_v17 = vpack.c.bf16 %v51_v16, %v50_v15  ;;  %v172_v20 = vpack.c.bf16 %v53_v19, %v52_v18  ;;  %v54_v21 = vld [vmem:[#allocation2 + $0x50] sm:$0xff]  ;;  %v55_v22 = vld [vmem:[#allocation2 + $0x58] sm:$0xff]  ;;  %v56_v24 = vld [vmem:[#allocation2 + $0x60] sm:$0xff] }
  0x17   :  { %162 = vmatprep.subr.bf16.mxu0 %v228_v0  ;;  %158 = vmatprep.mubr.msk.f32.mxu0 %vm42_vm0, %v156_v9  ;;  %v175_v23 = vpack.c.bf16 %v55_v22, %v54_v21  ;;  %v57_v25 = vld [vmem:[#allocation2 + $0x68] sm:$0xff]  ;;  %v58_v27 = vld [vmem:[#allocation2 + $0x70] sm:$0xff]  ;;  %v59_v28 = vld [vmem:[#allocation2 + $0x78] sm:$0xff] }
  0x18   :  { %v178_v26 = vpack.c.bf16 %v57_v25, %v56_v24  ;;  %v181_v29 = vpack.c.bf16 %v59_v28, %v58_v27  ;;  %v60_v30 = vld [vmem:[#allocation2 + $0x80] sm:$0xff]  ;;  %v61_v31 = vld [vmem:[#allocation2 + $0x88] sm:$0xff]  ;;  %v62_v33 = vld [vmem:[#allocation2 + $0x90] sm:$0xff] }
  0x19   :  { %v184_v32 = vpack.c.bf16 %v61_v31, %v60_v30  ;;  %v63_v34 = vld [vmem:[#allocation2 + $0x98] sm:$0xff]  ;;  %v64_v36 = vld [vmem:[#allocation2 + $0xa0] sm:$0xff]  ;;  %v65_v37 = vld [vmem:[#allocation2 + $0xa8] sm:$0xff] }
  0x1a   :  { %164 = vmatpush1.bf16.msra.mxu0 %v163_v11  ;;  %v187_v35 = vpack.c.bf16 %v63_v34, %v62_v33  ;;  %v190_v38 = vpack.c.bf16 %v65_v37, %v64_v36  ;;  %v66_v39 = vld [vmem:[#allocation2 + $0xb0] sm:$0xff]  ;;  %v67_v40 = vld [vmem:[#allocation2 + $0xb8] sm:$0xff]  ;;  %v157_v44 = vld [vmem:[%s288_s2] ss:$0 sm:$0xff] }
  0x1b   :  { %165 = vmatprep.subr.bf16.mxu0 %v228_v0  ;;  %v193_v41 = vpack.c.bf16 %v67_v40, %v66_v39 }
  0x1e   :  { %167 = vmatpush1.bf16.msra.mxu0 %v166_v14 }
  0x1f   :  { %168 = vmatprep.subr.bf16.mxu0 %v228_v0 }
  0x22   :  { %170 = vmatpush1.bf16.msra.mxu0 %v169_v17 }
  0x23   :  { %171 = vmatprep.subr.bf16.mxu0 %v228_v0 }
  0x26   :  { %173 = vmatpush1.bf16.msra.mxu0 %v172_v20 }
  0x27   :  { %174 = vmatprep.subr.bf16.mxu0 %v228_v0 }
  0x2a   :  { %176 = vmatpush1.bf16.msra.mxu0 %v175_v23 }
  0x2b   :  { %177 = vmatprep.subr.bf16.mxu0 %v228_v0 }
  0x2e   :  { %179 = vmatpush1.bf16.msra.mxu0 %v178_v26 }
  0x2f   :  { %180 = vmatprep.subr.bf16.mxu0 %v228_v0 }
  0x32   :  { %182 = vmatpush1.bf16.msra.mxu0 %v181_v29 }
  0x33   :  { %183 = vmatprep.subr.bf16.mxu0 %v228_v0 }
  0x36   :  { %185 = vmatpush1.bf16.msra.mxu0 %v184_v32 }
  0x37   :  { %186 = vmatprep.subr.bf16.mxu0 %v228_v0 }
  0x3a   :  { %188 = vmatpush1.bf16.msra.mxu0 %v187_v35 }
  0x3b   :  { %189 = vmatprep.subr.bf16.mxu0 %v228_v0 }
  0x3e   :  { %191 = vmatpush1.bf16.msra.mxu0 %v190_v38 }
  0x3f   :  { %192 = vmatprep.subr.bf16.mxu0 %v228_v0 }
  0x42   :  { %194 = vmatpush1.bf16.msra.mxu0 %v193_v41 }
  0x88   :  { %v40_v42 = vpop.permute.xlu0 %39 }
  0x89   :  { %v43_v43 = vsel %vm42_vm0, %v154_v10, %v40_v42 }
  0x8a   :  { %143 = vmatmul.mubr.f32.vlgmr.msra.gmra.mrb[0].mxu0 %v43_v43 }
 0x15d   :  { %v144_v45 = vpop.f32.mrb[0].mxu0 }
 0x15e   :  { %v145_v46 = vadd.f32 %v157_v44, %v144_v45  ;;  %v146_v47 = vpop.f32.mrb[1].mxu0 }
 0x160   :  { %148 = vst [vmem:[%s289_s3] sm:$0x3] %v145_v46 }
 0x161   :  { %153 = vsyncpa [#allocation3], 1 }

</bundles_post_ra>
